<compile_context>
chip_gen: v7x
topology: tpu7x:2x2x1
jax: 0.10.0
libtpu: 0.0.40
codegen_flags: <defaults>
</compile_context>

<pallas_src>
import jax
import jax.numpy as jnp
from jax.experimental import pallas as pl
from jax.experimental.pallas import tpu as pltpu


def _copy_kernel(x_ref, o_ref):
    # The whole "forward" of DummyTransformerBlock: return x unchanged.
    o_ref[...] = x_ref[...]


def _choose_lane_width(n_elems: int) -> int:
    """Largest lane width (multiple of 128) that divides the element count."""
    for lane in (2048, 1024, 512, 256, 128):
        if n_elems % lane == 0:
            return lane
    return 0  # no lane-dense factorization without padding


def _choose_tile_rows(rows: int, lane: int, itemsize: int) -> int:
    """Largest multiple-of-8 divisor of `rows` giving ~<=2 MiB blocks."""
    target = max(8, (2 * 1024 * 1024) // (lane * itemsize))
    best = 0
    t = 8
    while t <= min(rows, target):
        if rows % t == 0:
            best = t
        t += 8
    # Fall back to the full row extent (full-dim exception to the (8,128) rule).
    return best if best > 0 else rows


@jax.jit
def dummy_transformer_block(x: jax.Array) -> jax.Array:
    """Pallas equivalent of DummyTransformerBlock.forward(x) -> x."""
    n = x.size
    lane = _choose_lane_width(n)
    if lane == 0:
        # Element count not a multiple of 128: a lane-dense slab would need
        # padding; the identity is best served by not launching a kernel.
        return x

    rows = n // lane
    itemsize = jnp.dtype(x.dtype).itemsize
    tile_rows = _choose_tile_rows(rows, lane, itemsize)
    grid = (rows // tile_rows,)

    x2d = x.reshape(rows, lane)
    y2d = pl.pallas_call(
        _copy_kernel,
        out_shape=jax.ShapeDtypeStruct((rows, lane), x.dtype),
        grid=grid,
        in_specs=[pl.BlockSpec((tile_rows, lane), lambda i: (i, 0))],
        out_specs=pl.BlockSpec((tile_rows, lane), lambda i: (i, 0)),
        input_output_aliases={0: 0},  # donate the (intermediate) input buffer
        compiler_params=pltpu.CompilerParams(
            dimension_semantics=("parallel",),
        ),
    )(x2d)
    return y2d.reshape(x.shape)


if __name__ == "__main__":
    # DummyTransformerBlock.__init__ takes a cfg but defines no parameters,
    # so there are no weights to initialize.
    key = jax.random.PRNGKey(0)
    batch, seq, emb = 2, 8, 32
    x = jax.random.normal(key, (batch, seq, emb), dtype=jnp.float32)

    y = dummy_transformer_block(x)
    y = jax.block_until_ready(y)

    assert y.shape == x.shape and y.dtype == x.dtype
    assert bool(jnp.array_equal(y, x))
    print("KERNEL_OK")
</pallas_src>

<mosaic_0001>
module attributes {stable_mosaic.version = 11 : i64} {
  func.func @_copy_kernel(%arg0: i32, %arg1: memref<1x512xf32, #tpu.memory_space<vmem>>, %arg2: memref<1x512xf32, #tpu.memory_space<vmem>>) attributes {dimension_semantics = [#tpu.dimension_semantics<parallel>], iteration_bounds = array<i64: 1>, scalar_prefetch = 0 : i64, scratch_operands = 0 : i64, tpu.core_type = #tpu.core_type<tc>, window_params = [{transform_indices = @transform_0, window_bounds = array<i64: 1, 512>}, {transform_indices = @transform_1, window_bounds = array<i64: 1, 512>}]} {
    %c0 = arith.constant 0 : index
    %c0_0 = arith.constant 0 : index
    %0 = vector.load %arg1[%c0, %c0_0] : memref<1x512xf32, #tpu.memory_space<vmem>>, vector<1x512xf32>
    %c0_1 = arith.constant 0 : index
    %c0_2 = arith.constant 0 : index
    %1 = vector.load %arg2[%c0_1, %c0_2] : memref<1x512xf32, #tpu.memory_space<vmem>>, vector<1x512xf32>
    tpu.vector_store %arg2[%c0_1, %c0_2], %0 {strides = array<i32>} : memref<1x512xf32, #tpu.memory_space<vmem>>, vector<1x512xf32>,
    return
  }
  func.func @transform_0(%arg0: i32) -> (i32, i32) {
    %c0_i32 = arith.constant 0 : i32
    %c0_i32_0 = arith.constant 0 : i32
    return %arg0, %c0_i32 : i32, i32
  }
  func.func @transform_1(%arg0: i32) -> (i32, i32) {
    %c0_i32 = arith.constant 0 : i32
    %c0_i32_0 = arith.constant 0 : i32
    return %arg0, %c0_i32 : i32, i32
  }
}

</mosaic_0001>

<bundles_post_ra>
// kernel: dummy_transformer_block.1
= control target key start
LH: loop header
LB: loop body
LE: loop exit
PB: predicated region body
PF: predicated region fallthrough
CT: control target
= control target key end

     0   :  { %v9_v0 = vlaneseq  ;;  %s34_s0 = inlined_call_operand.vmem [shape: f32[1,512], index: 0, kind: input, shape index: {}, may-alias: {0,1}]   ;;  %s35_s1 = inlined_call_operand.vmem [shape: f32[1,512], index: 1, kind: output, shape index: {}, may-alias: {0,1}]  }
   0x1   :  { %v8_v1 = vld [vmem:[%s34_s0] sm:$0xf] }
   0x2   :  { %vm11_vm0 = vcmp.lt.s32.totalorder %v9_v0, 512 }
   0x3   :  { %13 = vst.msk [vmem:[%s35_s1] sm:$0xf] %vm11_vm0, %v8_v1 }

</bundles_post_ra>
